<compile_context>
chip_gen: v7x
topology: tpu7x:2x2x1
jax: 0.10.0
libtpu: 0.0.40
codegen_flags: <defaults>
</compile_context>

<pallas_src>
import functools

import jax
import jax.numpy as jnp
from jax.experimental import pallas as pl
from jax.experimental.pallas import tpu as pltpu


def _convlstm_relu_kernel(xp_ref, w_ref, b_ref, m_ref, o_ref, *, W, hidden, L, pad):
    """One batch element: 3x3 conv (9 shifted matmuls) + LSTM gates + ReLU.

    xp_ref: (1, Cp, Lp)       zero-padded flat image (channels on sublanes, pixels on lanes)
    w_ref : (9, 4*hidden, Cp) per-tap conv weights
    b_ref : (4*hidden, 1)     conv bias
    m_ref : (2, L)            width-edge masks for the kx=0 / kx=2 taps
    o_ref : (1, hidden, L)    relu(h_1)
    """
    xv = xp_ref[0]                        # (Cp, Lp)
    masks = m_ref[...]                    # (2, L)

    acc = None
    for ky in range(3):
        for kx in range(3):
            t = ky * 3 + kx
            s = pad + (ky - 1) * W + (kx - 1)   # static lane offset of this tap
            xs = xv[:, s:s + L]                 # (Cp, L)
            if kx == 0:                         # source column x-1: invalid at x == 0
                xs = xs * masks[0:1, :]
            elif kx == 2:                       # source column x+1: invalid at x == W-1
                xs = xs * masks[1:2, :]
            d = jnp.dot(w_ref[t], xs, preferred_element_type=jnp.float32)
            acc = d if acc is None else acc + d

    cc = acc + b_ref[...]                 # (4*hidden, L); bias broadcasts over lanes

    hd = hidden
    i_g = jax.nn.sigmoid(cc[0:hd])                  # input gate
    # forget gate sigmoid(cc[hd:2*hd]) multiplies c_prev == 0 -> exact no-op, skipped
    o_g = jax.nn.sigmoid(cc[2 * hd:3 * hd])         # output gate
    g_g = jnp.tanh(cc[3 * hd:4 * hd])               # cell candidate

    c1 = i_g * g_g                                  # c_next = f*0 + i*g
    h1 = o_g * jnp.tanh(c1)                         # h_next
    o_ref[0] = jnp.maximum(h1, 0.0).astype(o_ref.dtype)   # ReLU


def conv_lstm2d_relu_forward(x, w_conv, b_conv):
    """x: (N, C, H, W) NCHW.  w_conv: (4*Hd, C+Hd, 3, 3), b_conv: (4*Hd,).

    Returns relu(h_1) of ConvLSTM layer 0 at t=0, shape (N, Hd, H, W) — the
    exact output of ConvLstm2DRelu.forward.
    """
    N, C, H, W = x.shape
    four_hd = w_conv.shape[0]
    hidden = four_hd // 4
    L = H * W
    pad = W + 1                         # flat zero-padding covers the ky = 0/2 row shifts
    Lp = L + 2 * pad
    Cp = ((C + 7) // 8) * 8             # pad channels to a sublane multiple (zeros are inert)

    # Flatten spatial (contiguous reshape, free) and zero-pad flat + channels.
    xf = x.reshape(N, C, L)
    xp = jnp.pad(xf, ((0, 0), (0, Cp - C), (pad, pad)))

    # Only the input-channel slice of the weight matters (h_{t-1} == 0).
    w_in = w_conv[:, :C, :, :]
    w_in = jnp.pad(w_in, ((0, 0), (0, Cp - C), (0, 0), (0, 0)))
    # (4Hd, Cp, ky, kx) -> (ky, kx, 4Hd, Cp) -> (9, 4Hd, Cp), tap t = ky*3+kx
    w_taps = jnp.transpose(w_in, (2, 3, 0, 1)).reshape(9, four_hd, Cp)
    b = b_conv.reshape(four_hd, 1)

    # Lane masks killing the width wrap-around of the kx=0 / kx=2 taps.
    xpos = jnp.arange(L, dtype=jnp.int32) % W
    masks = jnp.stack([(xpos != 0), (xpos != W - 1)]).astype(x.dtype)   # (2, L)

    kernel = functools.partial(_convlstm_relu_kernel, W=W, hidden=hidden, L=L, pad=pad)

    out_flat = pl.pallas_call(
        kernel,
        out_shape=jax.ShapeDtypeStruct((N, hidden, L), x.dtype),
        grid_spec=pltpu.PrefetchScalarGridSpec(
            num_scalar_prefetch=0,
            grid=(N,),
            in_specs=[
                pl.BlockSpec((1, Cp, Lp), lambda n: (n, 0, 0)),       # padded flat image
                pl.BlockSpec((9, four_hd, Cp), lambda n: (0, 0, 0)),  # per-tap weights
                pl.BlockSpec((four_hd, 1), lambda n: (0, 0)),         # bias
                pl.BlockSpec((2, L), lambda n: (0, 0)),               # edge masks
            ],
            out_specs=pl.BlockSpec((1, hidden, L), lambda n: (n, 0, 0)),
        ),
        compiler_params=pltpu.CompilerParams(dimension_semantics=("parallel",)),
    )(xp, w_taps, b, masks)

    # (N, Hd, H*W) -> (N, Hd, H, W): contiguous reshape, no transpose / copy.
    return out_flat.reshape(N, hidden, H, W)


def make_params(key, in_channels, hidden):
    """ConvLSTMCell layer-0 conv parameters, PyTorch-style uniform init."""
    kw, kb = jax.random.split(key)
    fan_in = (in_channels + hidden) * 9
    bound = 1.0 / jnp.sqrt(fan_in)
    w = jax.random.uniform(kw, (4 * hidden, in_channels + hidden, 3, 3),
                           jnp.float32, -bound, bound)
    b = jax.random.uniform(kb, (4 * hidden,), jnp.float32, -bound, bound)
    return w, b


def _reference(x, w_conv, b_conv):
    """Plain-JAX replica of the PyTorch forward (ConvLSTM layer 0, t=0, + ReLU)."""
    N, C, H, W = x.shape
    hidden = w_conv.shape[0] // 4
    h0 = jnp.zeros((N, hidden, H, W), x.dtype)
    c0 = jnp.zeros((N, hidden, H, W), x.dtype)
    combined = jnp.concatenate([x, h0], axis=1)
    cc = jax.lax.conv_general_dilated(
        combined, w_conv, window_strides=(1, 1), padding='SAME',
        dimension_numbers=('NCHW', 'OIHW', 'NCHW')) + b_conv[None, :, None, None]
    cc_i, cc_f, cc_o, cc_g = jnp.split(cc, 4, axis=1)
    i = jax.nn.sigmoid(cc_i)
    f = jax.nn.sigmoid(cc_f)
    o = jax.nn.sigmoid(cc_o)
    g = jnp.tanh(cc_g)
    c1 = f * c0 + i * g
    h1 = o * jnp.tanh(c1)
    return jax.nn.relu(h1)


if __name__ == "__main__":
    key = jax.random.PRNGKey(0)
    k_in, k_par = jax.random.split(key)

    # Small shapes consistent with the module: in_channels=4, hidden_dim[0]=16 (default).
    N, C, H, W = 2, 4, 16, 16
    hidden = 16

    x = jax.random.normal(k_in, (N, C, H, W), jnp.float32)
    w_conv, b_conv = make_params(k_par, C, hidden)

    out = conv_lstm2d_relu_forward(x, w_conv, b_conv)
    out = jax.block_until_ready(out)

    ref = _reference(x, w_conv, b_conv)
    assert out.shape == (N, hidden, H, W)
    assert jnp.allclose(out, ref, atol=1e-4, rtol=1e-4), "mismatch vs reference"

    print("KERNEL_OK")
</pallas_src>

<mosaic_0001>
module attributes {stable_mosaic.version = 11 : i64} {
  func.func @_convlstm_relu_kernel(%arg0: i32, %arg1: memref<1x8x290xf32, #tpu.memory_space<vmem>>, %arg2: memref<9x64x8xf32, #tpu.memory_space<vmem>>, %arg3: memref<64x1xf32, #tpu.memory_space<vmem>>, %arg4: memref<2x256xf32, #tpu.memory_space<vmem>>, %arg5: memref<1x16x256xf32, #tpu.memory_space<vmem>>) attributes {dimension_semantics = [#tpu.dimension_semantics<parallel>], iteration_bounds = array<i64: 2>, scalar_prefetch = 0 : i64, scratch_operands = 0 : i64, tpu.core_type = #tpu.core_type<tc>, window_params = [{transform_indices = @transform_0, window_bounds = array<i64: 1, 8, 290>}, {pipeline_mode = #tpu.pipeline_mode<synchronous>, transform_indices = @transform_1, window_bounds = array<i64: 9, 64, 8>}, {pipeline_mode = #tpu.pipeline_mode<synchronous>, transform_indices = @transform_2, window_bounds = array<i64: 64, 1>}, {pipeline_mode = #tpu.pipeline_mode<synchronous>, transform_indices = @transform_3, window_bounds = array<i64: 2, 256>}, {transform_indices = @transform_4, window_bounds = array<i64: 1, 16, 256>}]} {
    %c0 = arith.constant 0 : index
    %c0_0 = arith.constant 0 : index
    %c0_1 = arith.constant 0 : index
    %0 = vector.load %arg1[%c0, %c0_0, %c0_1] : memref<1x8x290xf32, #tpu.memory_space<vmem>>, vector<1x8x290xf32>
    %1 = vector.shape_cast %0 : vector<1x8x290xf32> to vector<8x290xf32>
    %c0_2 = arith.constant 0 : index
    %c0_3 = arith.constant 0 : index
    %2 = vector.load %arg4[%c0_2, %c0_3] : memref<2x256xf32, #tpu.memory_space<vmem>>, vector<2x256xf32>
    %3 = vector.extract_strided_slice %1 {offsets = [0, 0], sizes = [8, 256], strides = [1, 1]} : vector<8x290xf32> to vector<8x256xf32>
    %4 = vector.extract_strided_slice %2 {offsets = [0, 0], sizes = [1, 256], strides = [1, 1]} : vector<2x256xf32> to vector<1x256xf32>
    %5 = vector.broadcast %4 : vector<1x256xf32> to vector<8x256xf32>
    %6 = arith.mulf %3, %5 : vector<8x256xf32>
    %c0_4 = arith.constant 0 : index
    %c0_5 = arith.constant 0 : index
    %c0_6 = arith.constant 0 : index
    %7 = vector.load %arg2[%c0_4, %c0_5, %c0_6] : memref<9x64x8xf32, #tpu.memory_space<vmem>>, vector<1x64x8xf32>
    %8 = vector.shape_cast %7 : vector<1x64x8xf32> to vector<64x8xf32>
    %cst = arith.constant dense<0.000000e+00> : vector<64x256xf32>
    %9 = tpu.matmul %8, %6, %cst {dimension_numbers = #tpu.dot_dimension_numbers<[1], [0], [0], [1], [0, 0, 1, 1], [], []>} : vector<64x8xf32>, vector<8x256xf32>, vector<64x256xf32> -> vector<64x256xf32>
    %10 = vector.extract_strided_slice %1 {offsets = [0, 1], sizes = [8, 256], strides = [1, 1]} : vector<8x290xf32> to vector<8x256xf32>
    %c1 = arith.constant 1 : index
    %c0_7 = arith.constant 0 : index
    %c0_8 = arith.constant 0 : index
    %11 = vector.load %arg2[%c1, %c0_7, %c0_8] : memref<9x64x8xf32, #tpu.memory_space<vmem>>, vector<1x64x8xf32>
    %12 = vector.shape_cast %11 : vector<1x64x8xf32> to vector<64x8xf32>
    %cst_9 = arith.constant dense<0.000000e+00> : vector<64x256xf32>
    %13 = tpu.matmul %12, %10, %cst_9 {dimension_numbers = #tpu.dot_dimension_numbers<[1], [0], [0], [1], [0, 0, 1, 1], [], []>} : vector<64x8xf32>, vector<8x256xf32>, vector<64x256xf32> -> vector<64x256xf32>
    %14 = arith.addf %9, %13 : vector<64x256xf32>
    %15 = vector.extract_strided_slice %1 {offsets = [0, 2], sizes = [8, 256], strides = [1, 1]} : vector<8x290xf32> to vector<8x256xf32>
    %16 = vector.extract_strided_slice %2 {offsets = [1, 0], sizes = [1, 256], strides = [1, 1]} : vector<2x256xf32> to vector<1x256xf32>
    %17 = vector.broadcast %16 : vector<1x256xf32> to vector<8x256xf32>
    %18 = arith.mulf %15, %17 : vector<8x256xf32>
    %c2 = arith.constant 2 : index
    %c0_10 = arith.constant 0 : index
    %c0_11 = arith.constant 0 : index
    %19 = vector.load %arg2[%c2, %c0_10, %c0_11] : memref<9x64x8xf32, #tpu.memory_space<vmem>>, vector<1x64x8xf32>
    %20 = vector.shape_cast %19 : vector<1x64x8xf32> to vector<64x8xf32>
    %cst_12 = arith.constant dense<0.000000e+00> : vector<64x256xf32>
    %21 = tpu.matmul %20, %18, %cst_12 {dimension_numbers = #tpu.dot_dimension_numbers<[1], [0], [0], [1], [0, 0, 1, 1], [], []>} : vector<64x8xf32>, vector<8x256xf32>, vector<64x256xf32> -> vector<64x256xf32>
    %22 = arith.addf %14, %21 : vector<64x256xf32>
    %23 = vector.extract_strided_slice %1 {offsets = [0, 16], sizes = [8, 256], strides = [1, 1]} : vector<8x290xf32> to vector<8x256xf32>
    %24 = vector.extract_strided_slice %2 {offsets = [0, 0], sizes = [1, 256], strides = [1, 1]} : vector<2x256xf32> to vector<1x256xf32>
    %25 = vector.broadcast %24 : vector<1x256xf32> to vector<8x256xf32>
    %26 = arith.mulf %23, %25 : vector<8x256xf32>
    %c3 = arith.constant 3 : index
    %c0_13 = arith.constant 0 : index
    %c0_14 = arith.constant 0 : index
    %27 = vector.load %arg2[%c3, %c0_13, %c0_14] : memref<9x64x8xf32, #tpu.memory_space<vmem>>, vector<1x64x8xf32>
    %28 = vector.shape_cast %27 : vector<1x64x8xf32> to vector<64x8xf32>
    %cst_15 = arith.constant dense<0.000000e+00> : vector<64x256xf32>
    %29 = tpu.matmul %28, %26, %cst_15 {dimension_numbers = #tpu.dot_dimension_numbers<[1], [0], [0], [1], [0, 0, 1, 1], [], []>} : vector<64x8xf32>, vector<8x256xf32>, vector<64x256xf32> -> vector<64x256xf32>
    %30 = arith.addf %22, %29 : vector<64x256xf32>
    %31 = vector.extract_strided_slice %1 {offsets = [0, 17], sizes = [8, 256], strides = [1, 1]} : vector<8x290xf32> to vector<8x256xf32>
    %c4 = arith.constant 4 : index
    %c0_16 = arith.constant 0 : index
    %c0_17 = arith.constant 0 : index
    %32 = vector.load %arg2[%c4, %c0_16, %c0_17] : memref<9x64x8xf32, #tpu.memory_space<vmem>>, vector<1x64x8xf32>
    %33 = vector.shape_cast %32 : vector<1x64x8xf32> to vector<64x8xf32>
    %cst_18 = arith.constant dense<0.000000e+00> : vector<64x256xf32>
    %34 = tpu.matmul %33, %31, %cst_18 {dimension_numbers = #tpu.dot_dimension_numbers<[1], [0], [0], [1], [0, 0, 1, 1], [], []>} : vector<64x8xf32>, vector<8x256xf32>, vector<64x256xf32> -> vector<64x256xf32>
    %35 = arith.addf %30, %34 : vector<64x256xf32>
    %36 = vector.extract_strided_slice %1 {offsets = [0, 18], sizes = [8, 256], strides = [1, 1]} : vector<8x290xf32> to vector<8x256xf32>
    %37 = vector.extract_strided_slice %2 {offsets = [1, 0], sizes = [1, 256], strides = [1, 1]} : vector<2x256xf32> to vector<1x256xf32>
    %38 = vector.broadcast %37 : vector<1x256xf32> to vector<8x256xf32>
    %39 = arith.mulf %36, %38 : vector<8x256xf32>
    %c5 = arith.constant 5 : index
    %c0_19 = arith.constant 0 : index
    %c0_20 = arith.constant 0 : index
    %40 = vector.load %arg2[%c5, %c0_19, %c0_20] : memref<9x64x8xf32, #tpu.memory_space<vmem>>, vector<1x64x8xf32>
    %41 = vector.shape_cast %40 : vector<1x64x8xf32> to vector<64x8xf32>
    %cst_21 = arith.constant dense<0.000000e+00> : vector<64x256xf32>
    %42 = tpu.matmul %41, %39, %cst_21 {dimension_numbers = #tpu.dot_dimension_numbers<[1], [0], [0], [1], [0, 0, 1, 1], [], []>} : vector<64x8xf32>, vector<8x256xf32>, vector<64x256xf32> -> vector<64x256xf32>
    %43 = arith.addf %35, %42 : vector<64x256xf32>
    %44 = vector.extract_strided_slice %1 {offsets = [0, 32], sizes = [8, 256], strides = [1, 1]} : vector<8x290xf32> to vector<8x256xf32>
    %45 = vector.extract_strided_slice %2 {offsets = [0, 0], sizes = [1, 256], strides = [1, 1]} : vector<2x256xf32> to vector<1x256xf32>
    %46 = vector.broadcast %45 : vector<1x256xf32> to vector<8x256xf32>
    %47 = arith.mulf %44, %46 : vector<8x256xf32>
    %c6 = arith.constant 6 : index
    %c0_22 = arith.constant 0 : index
    %c0_23 = arith.constant 0 : index
    %48 = vector.load %arg2[%c6, %c0_22, %c0_23] : memref<9x64x8xf32, #tpu.memory_space<vmem>>, vector<1x64x8xf32>
    %49 = vector.shape_cast %48 : vector<1x64x8xf32> to vector<64x8xf32>
    %cst_24 = arith.constant dense<0.000000e+00> : vector<64x256xf32>
    %50 = tpu.matmul %49, %47, %cst_24 {dimension_numbers = #tpu.dot_dimension_numbers<[1], [0], [0], [1], [0, 0, 1, 1], [], []>} : vector<64x8xf32>, vector<8x256xf32>, vector<64x256xf32> -> vector<64x256xf32>
    %51 = arith.addf %43, %50 : vector<64x256xf32>
    %52 = vector.extract_strided_slice %1 {offsets = [0, 33], sizes = [8, 256], strides = [1, 1]} : vector<8x290xf32> to vector<8x256xf32>
    %c7 = arith.constant 7 : index
    %c0_25 = arith.constant 0 : index
    %c0_26 = arith.constant 0 : index
    %53 = vector.load %arg2[%c7, %c0_25, %c0_26] : memref<9x64x8xf32, #tpu.memory_space<vmem>>, vector<1x64x8xf32>
    %54 = vector.shape_cast %53 : vector<1x64x8xf32> to vector<64x8xf32>
    %cst_27 = arith.constant dense<0.000000e+00> : vector<64x256xf32>
    %55 = tpu.matmul %54, %52, %cst_27 {dimension_numbers = #tpu.dot_dimension_numbers<[1], [0], [0], [1], [0, 0, 1, 1], [], []>} : vector<64x8xf32>, vector<8x256xf32>, vector<64x256xf32> -> vector<64x256xf32>
    %56 = arith.addf %51, %55 : vector<64x256xf32>
    %57 = vector.extract_strided_slice %1 {offsets = [0, 34], sizes = [8, 256], strides = [1, 1]} : vector<8x290xf32> to vector<8x256xf32>
    %58 = vector.extract_strided_slice %2 {offsets = [1, 0], sizes = [1, 256], strides = [1, 1]} : vector<2x256xf32> to vector<1x256xf32>
    %59 = vector.broadcast %58 : vector<1x256xf32> to vector<8x256xf32>
    %60 = arith.mulf %57, %59 : vector<8x256xf32>
    %c8 = arith.constant 8 : index
    %c0_28 = arith.constant 0 : index
    %c0_29 = arith.constant 0 : index
    %61 = vector.load %arg2[%c8, %c0_28, %c0_29] : memref<9x64x8xf32, #tpu.memory_space<vmem>>, vector<1x64x8xf32>
    %62 = vector.shape_cast %61 : vector<1x64x8xf32> to vector<64x8xf32>
    %cst_30 = arith.constant dense<0.000000e+00> : vector<64x256xf32>
    %63 = tpu.matmul %62, %60, %cst_30 {dimension_numbers = #tpu.dot_dimension_numbers<[1], [0], [0], [1], [0, 0, 1, 1], [], []>} : vector<64x8xf32>, vector<8x256xf32>, vector<64x256xf32> -> vector<64x256xf32>
    %64 = arith.addf %56, %63 : vector<64x256xf32>
    %c0_31 = arith.constant 0 : index
    %c0_32 = arith.constant 0 : index
    %65 = vector.load %arg3[%c0_31, %c0_32] : memref<64x1xf32, #tpu.memory_space<vmem>>, vector<64x1xf32>
    %66 = vector.broadcast %65 : vector<64x1xf32> to vector<64x256xf32>
    %67 = arith.addf %64, %66 : vector<64x256xf32>
    %68 = vector.extract_strided_slice %67 {offsets = [0, 0], sizes = [16, 256], strides = [1, 1]} : vector<64x256xf32> to vector<16x256xf32>
    %69 = arith.negf %68 : vector<16x256xf32>
    %70 = math.exp %69 : vector<16x256xf32>
    %cst_33 = arith.constant 1.000000e+00 : f32
    %71 = vector.broadcast %cst_33 : f32 to vector<16x256xf32>
    %72 = arith.addf %71, %70 : vector<16x256xf32>
    %73 = arith.divf %71, %72 : vector<16x256xf32>
    %74 = vector.extract_strided_slice %67 {offsets = [32, 0], sizes = [16, 256], strides = [1, 1]} : vector<64x256xf32> to vector<16x256xf32>
    %75 = arith.negf %74 : vector<16x256xf32>
    %76 = math.exp %75 : vector<16x256xf32>
    %cst_34 = arith.constant 1.000000e+00 : f32
    %77 = vector.broadcast %cst_34 : f32 to vector<16x256xf32>
    %78 = arith.addf %77, %76 : vector<16x256xf32>
    %79 = arith.divf %77, %78 : vector<16x256xf32>
    %80 = vector.extract_strided_slice %67 {offsets = [48, 0], sizes = [16, 256], strides = [1, 1]} : vector<64x256xf32> to vector<16x256xf32>
    %81 = math.tanh %80 : vector<16x256xf32>
    %82 = arith.mulf %73, %81 : vector<16x256xf32>
    %83 = math.tanh %82 : vector<16x256xf32>
    %84 = arith.mulf %79, %83 : vector<16x256xf32>
    %cst_35 = arith.constant 0.000000e+00 : f32
    %85 = vector.broadcast %cst_35 : f32 to vector<16x256xf32>
    %86 = arith.maximumf %84, %85 : vector<16x256xf32>
    %c0_36 = arith.constant 0 : index
    %c0_37 = arith.constant 0 : index
    %c0_38 = arith.constant 0 : index
    %87 = vector.load %arg5[%c0_36, %c0_37, %c0_38] : memref<1x16x256xf32, #tpu.memory_space<vmem>>, vector<1x16x256xf32>
    %88 = vector.shape_cast %87 : vector<1x16x256xf32> to vector<16x256xf32>
    %89 = vector.shape_cast %86 : vector<16x256xf32> to vector<1x16x256xf32>
    tpu.vector_store %arg5[%c0_36, %c0_37, %c0_38], %89 {strides = array<i32>} : memref<1x16x256xf32, #tpu.memory_space<vmem>>, vector<1x16x256xf32>,
    return
  }
  func.func @transform_0(%arg0: i32) -> (i32, i32, i32) {
    %c0_i32 = arith.constant 0 : i32
    %c0_i32_0 = arith.constant 0 : i32
    %c0_i32_1 = arith.constant 0 : i32
    return %arg0, %c0_i32, %c0_i32_0 : i32, i32, i32
  }
  func.func @transform_1(%arg0: i32) -> (i32, i32, i32) {
    %c0_i32 = arith.constant 0 : i32
    %c0_i32_0 = arith.constant 0 : i32
    %c0_i32_1 = arith.constant 0 : i32
    %c0_i32_2 = arith.constant 0 : i32
    return %c0_i32, %c0_i32_0, %c0_i32_1 : i32, i32, i32
  }
  func.func @transform_2(%arg0: i32) -> (i32, i32) {
    %c0_i32 = arith.constant 0 : i32
    %c0_i32_0 = arith.constant 0 : i32
    %c0_i32_1 = arith.constant 0 : i32
    return %c0_i32, %c0_i32_0 : i32, i32
  }
  func.func @transform_3(%arg0: i32) -> (i32, i32) {
    %c0_i32 = arith.constant 0 : i32
    %c0_i32_0 = arith.constant 0 : i32
    %c0_i32_1 = arith.constant 0 : i32
    return %c0_i32, %c0_i32_0 : i32, i32
  }
  func.func @transform_4(%arg0: i32) -> (i32, i32, i32) {
    %c0_i32 = arith.constant 0 : i32
    %c0_i32_0 = arith.constant 0 : i32
    %c0_i32_1 = arith.constant 0 : i32
    return %arg0, %c0_i32, %c0_i32_0 : i32, i32, i32
  }
}

</mosaic_0001>

<bundles_post_ra>
// kernel: tpu_custom_call.1
= control target key start
LH: loop header
LB: loop body
LE: loop exit
PB: predicated region body
PF: predicated region fallthrough
CT: control target
= control target key end

     0   :  { %9 = vsyncpa [#allocation3], 0  ;;  %s2988_s0 = inlined_call_operand.vmem [shape: f32[2,8,290], index: 0, kind: input, shape index: {}]   ;;  %s2989_s1 = inlined_call_operand.vmem [shape: f32[9,64,8], index: 1, kind: input, shape index: {}]   ;;  %s2990_s2 = inlined_call_operand.vmem [shape: f32[64,1], index: 2, kind: input, shape index: {}]   ;;  %s2991_s3 = inlined_call_operand.vmem [shape: f32[2,256], index: 3, kind: input, shape index: {}]   ;;  %s2992_s4 = inlined_call_operand.hbm [shape: f32[2,16,256], index: 4, kind: output, shape index: {}]  }
   0x1   :  { %11 = vsyncpa [#allocation3 + $0x1], 0  ;;  %s2433_s15 = smov 0   ;;  %s2435_s16 = smov 0  }
   0x2   :  { %s2437_s17 = smov 0   ;;  %s2439_s18 = smov 0  }
   0x3 LB: > { %s2454_s19 = sadd.s32 4294967295, %s2389_s18   ;;  %s1967_s20 = sadd.s32 4294967294, %s2389_s18   ;;  %s2389_s18 = sphi %s2439_s18, %s2998_s18   ;;  %s2385_s17 = sphi %s2437_s17, %s2997_s17   ;;  %s2381_s16 = sphi %s2435_s16, %s2996_s16   ;;  %s2377_s15 = sphi %s2433_s15, %s2995_s15  }
   0x4   : > { %s2458_s21 = sadd.s32 1, %s2389_s18   ;;  %s113_s22 = sadd.s32 1, %s2385_s17 }
   0x5   : > { %s110_s23 = ssub.s32 %s2389_s18, %s2458_s21  ;;  %p123_p0 = scmp.ne.s32.totalorder %s2385_s17, %s2381_s16 }
   0x6   : > { %p111_p1 = scmp.eq.s32.totalorder %s110_s23, 0  ;;  %p124_p2 = scmp.eq.s32.totalorder %s2454_s19, 1 }
   0x7   : > { %p129_p3 = scmp.ne.s32.totalorder %s2381_s16, %s2377_s15  ;;  %p130_p4 = scmp.eq.s32.totalorder %s1967_s20, 1 }
   0x8   : > { %s2469_s24 = scalar_select %p111_p1, %s2385_s17, %s113_s22  }
   0x9   : > { %p2471_p5 = por %p124_p2, %p123_p0  ;;  %p2475_p6 = por %p130_p4, %p129_p3 }
   0xa   : > { %p1970_p7 = scmp.ge.s32.totalorder %s2389_s18, 1  ;;  %p165_p8 = scmp.lt.s32.totalorder %s2389_s18, 3 }
   0xc   : > { %p166_p9 = pnand %p1970_p7, %p165_p8 }
   0xd   : > { %v201_v0 = vlaneseq (!%p166_p9)  ;;  %p191_p10 = scmp.lt.s32.totalorder (!%p166_p9), %s2454_s19, 1  ;;  %v199_v2 = vld [vmem:[%s2991_s3] sm:$0xf] (!%p166_p9)  ;;  %s2391_s5 = smov (!%p166_p9), 18   ;;  %v2396_v18 = vmov (!%p166_p9), 0.0   ;;  %vm1070_vm0 = vcmask (!%p166_p9), 146432  }
   0xe   : > { %169 = sbr.rel (%p166_p9) target bundleno = 696 (0x2b8), region = 36  ;;  %s2392_s6 = smov (!%p166_p9), 32   ;;  %1009 = vmatprep.mubr.f32.mxu0 (!%p166_p9), %v2396_v18  ;;  %341 = vmatprep.mubr.f32.mxu1 (!%p166_p9), %v2396_v18  ;;  %vm247_vm1 = vcmask (!%p166_p9), 1039360   ;;  %vm1250_vm2 = vcmask (!%p166_p9), 261120   ;;  %vm916_vm3 = vcmask (!%p166_p9), 908288   ;;  %vm252_vm4 = vcmask (!%p166_p9), 64512  }
   0xf   : > { %v202_v1 = vshrl.u32 (!%p166_p9), %v201_v0, 7  ;;  %s2393_s10 = smov (!%p166_p9), 127   ;;  %s2394_s11 = smov (!%p166_p9), 111   ;;  %v2029_v39 = vld [vmem:[%s2989_s1 + $0x100] sm:$0xff] (!%p166_p9)  ;;  %vm543_vm5 = vcmask (!%p166_p9), 15360   ;;  %v2030_v45 = vld [vmem:[%s2989_s1 + $0x108] sm:$0xff] (!%p166_p9) }
  0x10   : > { %s2395_s12 = smov (!%p166_p9), 2   ;;  %s2397_s13 = smov (!%p166_p9), 110   ;;  %v1973_v42 = vld [vmem:[%s2989_s1 + $0x40] sm:$0xff] (!%p166_p9)  ;;  %v1974_v47 = vld [vmem:[%s2989_s1 + $0x48] sm:$0xff] (!%p166_p9)  ;;  %v2031_v52 = vld [vmem:[%s2989_s1 + $0x110] sm:$0xff] (!%p166_p9)  ;;  %vm1096_vm6 = vcmask (!%p166_p9), 900096  }
  0x11   : > { %v521_v3 = vsub.s32 (!%p166_p9), 1, %v202_v1  ;;  %v525_v4 = vsub.s32 (!%p166_p9), 3, %v202_v1  ;;  %v203_v5 = vsub.s32 (!%p166_p9), 0, %v202_v1  ;;  %v207_v6 = vsub.s32 (!%p166_p9), 2, %v202_v1  ;;  %s2398_s14 = smov (!%p166_p9), 16   ;;  %s2399_s20 = smov (!%p166_p9), 96  }
  0x12   : > { %s2400_s7 = smov (!%p166_p9), 34   ;;  %v1975_v53 = vld [vmem:[%s2989_s1 + $0x50] sm:$0xff] (!%p166_p9)  ;;  %v2032_v55 = vld [vmem:[%s2989_s1 + $0x118] sm:$0xff] (!%p166_p9)  ;;  %s2402_s27 = smov (!%p166_p9), 95   ;;  %v1977_v57 = vld [vmem:[%s2989_s1 + $0x60] sm:$0xff] (!%p166_p9)  ;;  %vm725_vm7 = vcmask (!%p166_p9), 130048  }
  0x13   : > { %v522_v7 = vrot.slane (!%p166_p9), %v199_v2, %v521_v3  ;;  %v526_v8 = vrot.slane (!%p166_p9), %v199_v2, %v525_v4  ;;  %v204_v9 = vrot.slane (!%p166_p9), %v199_v2, %v203_v5  ;;  %v208_v10 = vrot.slane (!%p166_p9), %v199_v2, %v207_v6  ;;  %v1976_v56 = vld [vmem:[%s2989_s1 + $0x58] sm:$0xff] (!%p166_p9)  ;;  %v1978_v58 = vld [vmem:[%s2989_s1 + $0x68] sm:$0xff] (!%p166_p9)  ;;  %v1979_v59 = vld [vmem:[%s2989_s1 + $0x70] sm:$0xff] (!%p166_p9)  ;;  %s188_s23 = sand.u32 (!%p166_p9), 1, %s2381_s16   ;;  %s2122_s28 = sshll.u32 (!%p166_p9), %s2454_s19, 9 }
  0x14   : > { %v1980_v60 = vld [vmem:[%s2989_s1 + $0x78] sm:$0xff] (!%p166_p9)  ;;  %v221_v61 = vld [vmem:[%s2989_s1] sm:$0xff] (!%p166_p9)  ;;  %v222_v62 = vld [vmem:[%s2989_s1 + $0x8] sm:$0xff] (!%p166_p9)  ;;  %vm1276_vm8 = vcmask (!%p166_p9), 785408   ;;  %vm1595_vm9 = vcmask (!%p166_p9), 277504   ;;  %vm569_vm10 = vcmask (!%p166_p9), 1031168  }
  0x15   : > { %s192_s29 = scalar_select %p191_p10, %s2454_s19, 1  ;;  %v2486_v11 = vrot.slane %v522_v7, %v521_v3  ;;  %v2488_v12 = vrot.slane %v204_v9, %v203_v5  ;;  %v2491_v13 = vrot.slane %v526_v8, %v521_v3  ;;  %v2494_v14 = vrot.slane %v208_v10, %v203_v5  ;;  %v223_v63 = vld [vmem:[%s2989_s1 + $0x10] sm:$0xff]  ;;  %v224_v0 = vld [vmem:[%s2989_s1 + $0x18] sm:$0xff]  ;;  %v225_v1 = vld [vmem:[%s2989_s1 + $0x20] sm:$0xff] }
  0x16   : > { %v226_v2 = vld [vmem:[%s2989_s1 + $0x28] sm:$0xff]  ;;  %v227_v3 = vld [vmem:[%s2989_s1 + $0x30] sm:$0xff]  ;;  %v228_v4 = vld [vmem:[%s2989_s1 + $0x38] sm:$0xff]  ;;  %vm1441_vm11 = vcmask 777216   ;;  %vm751_vm12 = vcmask 916480   ;;  %vm1621_vm13 = vcmask 769024  }
  0x17   : > { %s2221_s30 = smul.u32 24, %s192_s29  ;;  %1066 = vrot.lane.b32.xlu0 %v2486_v11, %s2391_s5  ;;  %1246 = vrot.lane.b32.xlu1 %v2488_v12, %s2392_s6  ;;  %v2045_v10 = vld [vmem:[%s2989_s1 + $0x140] sm:$0xff]  ;;  %s2404_s29 = smov 94  }
  0x18   : > { %s2946_s19 = scalar_lea.sflag [#allocation3], %s188_s23 }
  0x19   : > { %s195_s9 = scalar_lea.vmem %s2988_s0, %s2221_s30 }
  0x1a   : > { %v2501_v15 = vld [vmem:[%s195_s9 + $0x8] sm:$0xff]  ;;  %v2503_v16 = vld [vmem:[%s195_s9 + $0x10] sm:$0xff]  ;;  %v2509_v17 = vld [vmem:[%s195_s9] sm:$0xff]  ;;  %s2406_s9 = smov [#allocation2]  }
  0x1b   : > { %1068 = vrot.lane.b32.xlu0 %v2491_v13, %s2391_s5  ;;  %1248 = vrot.lane.b32.xlu1 %v2494_v14, %s2392_s6  ;;  %v220_v49 = vmul.f32 %v2494_v14, %v2501_v15  ;;  %v219_v50 = vmul.f32 %v2488_v12, %v2509_v17 }
  0x1f   : > { %243 = vrot.lane.b32.xlu0 %v2501_v15, %s2393_s10  ;;  %245 = vrot.lane.b32.xlu1 %v2503_v16, %s2393_s10 }
  0x23   : > { %912 = vrot.lane.b32.xlu0 %v2501_v15, %s2394_s11  ;;  %914 = vrot.lane.b32.xlu1 %v2503_v16, %s2394_s11 }
  0x27   : > { %241 = vrot.lane.b32.xlu0 %v2509_v17, %s2393_s10  ;;  %910 = vrot.lane.b32.xlu1 %v2509_v17, %s2394_s11  ;;  %s2331_s10 = sshll.u32 %s2406_s9, 4  ;;  %s2332_s10 = int_to_ptr.vmem [resolvable:$false] %s2331_s10 }
  0x28   : > { %s2333_s11 = scalar_lea.vmem %s2332_s10, 1024 }
  0x2b   : > { %541 = vrot.lane.b32.xlu1 %v2491_v13, %s2395_s12  ;;  %539 = vrot.lane.b32.xlu0 %v2486_v11, %s2395_s12  ;;  %s2401_s12 = smov 126  }
  0x89   : > { %v1067_v19 = vpop.permute.xlu0 %1066  ;;  %v1247_v20 = vpop.permute.xlu1 %1246 }
  0x8a   : > { %v1075_v29 = vmul.f32 %v1067_v19, %v2509_v17  ;;  %v1255_v30 = vmul.f32 %v1247_v20, %v2509_v17 }
  0x8d   : > { %v1069_v21 = vpop.permute.xlu0 %1068  ;;  %v1249_v22 = vpop.permute.xlu1 %1248 }
  0x8e   : > { %v1071_v23 = vsel %vm1070_vm0, %v1067_v19, %v1069_v21  ;;  %v1077_v24 = vmul.f32 %v1069_v21, %v2503_v16  ;;  %v1251_v31 = vsel %vm1250_vm2, %v1247_v20, %v1249_v22  ;;  %v1257_v36 = vmul.f32 %v1249_v22, %v2503_v16 }
  0x8f   : > { %v1076_v25 = vmul.f32 %v1071_v23, %v2501_v15  ;;  %v1256_v35 = vmul.f32 %v1251_v31, %v2501_v15 }
  0x90   : > { %1094 = vrot.lane.b32.xlu1 %v1077_v24, %s2397_s13 }
  0x91   : > { %1092 = vrot.lane.b32.xlu0 %v1076_v25, %s2397_s13  ;;  %v244_v26 = vpop.permute.xlu0 %243  ;;  %v246_v27 = vpop.permute.xlu1 %245 }
  0x92   : > { %v249_v28 = vsel %vm247_vm1, %v244_v26, %v246_v27 }
  0x93   : > { %277 = vmatprep.subr.mxu1 %v249_v28 }
  0x94   : > { %721 = vrot.lane.b32.xlu1 %v2488_v12, %s2398_s14 }
  0x95   : > { %1090 = vrot.lane.b32.xlu0 %v1075_v29, %s2397_s13  ;;  %v913_v32 = vpop.permute.xlu0 %912  ;;  %v915_v33 = vpop.permute.xlu1 %914 }
  0x96   : > { %v2525_v34 = vsel %vm916_vm3, %v913_v32, %v915_v33  ;;  %v2048_v33 = vld [vmem:[%s2989_s1 + $0x158] sm:$0xff] }
  0x97   : > { %945 = vmatprep.subr.mxu0 %v2525_v34 }
  0x98   : > { %1270 = vrot.lane.b32.xlu1 %v1255_v30, %s2399_s20 }
  0x99   : > { %723 = vrot.lane.b32.xlu0 %v2494_v14, %s2398_s14  ;;  %v242_v37 = vpop.permute.xlu0 %241  ;;  %v911_v38 = vpop.permute.xlu1 %910  ;;  %v2046_v14 = vld [vmem:[%s2989_s1 + $0x148] sm:$0xff] }
  0x9a   : > { %v248_v40 = vsel %vm247_vm1, %v242_v37, %v244_v26  ;;  %v2537_v41 = vsel %vm916_vm3, %v911_v38, %v913_v32  ;;  %v2047_v26 = vld [vmem:[%s2989_s1 + $0x150] sm:$0xff] }
  0x9b   : > { %278 = vmatpush1.msra.mxu1 %v248_v40  ;;  %946 = vmatpush1.msra.mxu0 %v2537_v41  ;;  %v2050_v40 = vld [vmem:[%s2989_s1 + $0x168] sm:$0xff] }
  0x9c   : > { %1272 = vrot.lane.b32.xlu1 %v1256_v35, %s2399_s20  ;;  %2037 = vmatmul.mubr.msk.f32.vlgmr.msra.gmra.mrb[0].mxu0 %vm252_vm4, %v2029_v39 }
  0x9d   : > { %1274 = vrot.lane.b32.xlu0 %v1257_v36, %s2399_s20  ;;  %v542_v43 = vpop.permute.xlu1 %541  ;;  %v540_v44 = vpop.permute.xlu0 %539  ;;  %1015 = vmatprep.mubr.f32.mxu0 %v2396_v18  ;;  %s2403_s20 = smov 112  }
  0x9e   : > { %v544_v46 = vsel %vm543_vm5, %v540_v44, %v542_v43  ;;  %1981 = vmatmul.mubr.msk.f32.vlgmr.msra.gmra.mrb[0].mxu1 %vm252_vm4, %v1973_v42  ;;  %v550_v48 = vmul.f32 %v542_v43, %v2503_v16  ;;  %410 = vmatprep.subr.mxu1 %v220_v49  ;;  %v548_v54 = vmul.f32 %v540_v44, %v2509_v17  ;;  %v1998_v44 = vld [vmem:[%s2989_s1 + $0x88] sm:$0xff] }
  0x9f   : > { %347 = vmatprep.mubr.f32.mxu1 %v2396_v18  ;;  %v549_v51 = vmul.f32 %v544_v46, %v2501_v15  ;;  %411 = vmatpush1.msra.mxu1 %v219_v50  ;;  %v2051_v46 = vld [vmem:[%s2989_s1 + $0x170] sm:$0xff]  ;;  %v2000_v50 = vld [vmem:[%s2989_s1 + $0x98] sm:$0xff] }
  0xa0   : > { %1593 = vrot.lane.b32.xlu1 %v2491_v13, %s2400_s7  ;;  %2038 = vmatmul.mubr.msk.f32.gmra.mrb[2].mxu0 %vm252_vm4, %v2030_v45 }
  0xa1   : > { %1591 = vrot.lane.b32.xlu0 %v2486_v11, %s2400_s7  ;;  %1021 = vmatprep.mubr.f32.mxu0 %v2396_v18  ;;  %s2942_s7 = scalar_lea.hbm %s2992_s4, %s2122_s28 }
  0xa2   : > { %1982 = vmatmul.mubr.msk.f32.gmra.mrb[2].mxu1 %vm252_vm4, %v1974_v47  ;;  %v1999_v47 = vld [vmem:[%s2989_s1 + $0x90] sm:$0xff] }
  0xa3   : > { %353 = vmatprep.mubr.f32.mxu1 %v2396_v18 }
  0xa4   : > { %567 = vrot.lane.b32.xlu1 %v550_v48, %s2401_s12  ;;  %2039 = vmatmul.mubr.msk.f32.gmra.mrb[4].mxu0 %vm252_vm4, %v2031_v52  ;;  %v2052_v48 = vld [vmem:[%s2989_s1 + $0x178] sm:$0xff] }
  0xa5   : > { %565 = vrot.lane.b32.xlu0 %v549_v51, %s2401_s12  ;;  %1025 = vmatprep.mubr.f32.mxu0 %v2396_v18  ;;  %v2061_v51 = vld [vmem:[%s2989_s1 + $0x180] sm:$0xff] }
  0xa6   : > { %1983 = vmatmul.mubr.msk.f32.gmra.mrb[4].mxu1 %vm252_vm4, %v1975_v53  ;;  %v2001_v53 = vld [vmem:[%s2989_s1 + $0xa0] sm:$0xff] }
  0xa7   : > { %357 = vmatprep.mubr.f32.mxu1 %v2396_v18 }
  0xa8   : > { %1437 = vrot.lane.b32.xlu1 %v2501_v15, %s2402_s27  ;;  %2040 = vmatmul.mubr.msk.f32.gmra.mrb[6].mxu0 %vm252_vm4, %v2032_v55  ;;  %v2002_v55 = vld [vmem:[%s2989_s1 + $0xa8] sm:$0xff] }
  0xa9   : > { %563 = vrot.lane.b32.xlu0 %v548_v54, %s2401_s12  ;;  %1189 = vmatprep.mubr.f32.mxu0 %v2396_v18  ;;  %v2062_v54 = vld [vmem:[%s2989_s1 + $0x188] sm:$0xff] }
  0xaa   : > { %1984 = vmatmul.mubr.msk.f32.gmra.mrb[6].mxu1 %vm252_vm4, %v1976_v56  ;;  %v2063_v56 = vld [vmem:[%s2989_s1 + $0x190] sm:$0xff] }
  0xab   : > { %361 = vmatprep.mubr.f32.mxu1 %v2396_v18 }
  0xac   : > { %1435 = vrot.lane.b32.xlu1 %v2509_v17, %s2402_s27 }
  0xad   : > { %1439 = vrot.lane.b32.xlu0 %v2503_v16, %s2402_s27  ;;  %s1971_s27 = sshll.u32 %s188_s23, 5 }
  0xae   : > { %1985 = vmatmul.mubr.msk.f32.gmra.mrb[8].mxu1 %vm252_vm4, %v1977_v57  ;;  %v2003_v57 = vld [vmem:[%s2989_s1 + $0xb0] sm:$0xff] }
  0xaf   : > { %367 = vmatprep.mubr.f32.mxu1 %v2396_v18 }
  0xb2   : > { %1986 = vmatmul.mubr.msk.f32.gmra.mrb[10].mxu1 %vm252_vm4, %v1978_v58  ;;  %v1771_v58 = vld [vmem:[%s2990_s2] sm:$0xff] }
  0xb3   : > { %373 = vmatprep.mubr.f32.mxu1 %v2396_v18 }
  0xb6   : > { %1987 = vmatmul.mubr.msk.f32.gmra.mrb[12].mxu1 %vm252_vm4, %v1979_v59  ;;  %v2064_v59 = vld [vmem:[%s2989_s1 + $0x198] sm:$0xff] }
  0xb7   : > { %379 = vmatprep.mubr.f32.mxu1 %v2396_v18 }
  0xba   : > { %1988 = vmatmul.mubr.msk.f32.gmra.mrb[14].mxu1 %vm252_vm4, %v1980_v60  ;;  %v2405_v60 = vmov 0  }
  0xbb   : > { %474 = vmatprep.mubr.f32.mxu1 %v2396_v18  ;;  %2277 = vset.pattern.permute.xlu0 %v2405_v60 }
  0xbc   : > { %2278 = vset.pattern.permute.xlu1 %v2405_v60 }
  0xbe   : > { %1989 = vmatmul.mubr.msk.f32.vlgmr.msra.gmra.mrb[0].mxu1 %vm252_vm4, %v221_v61  ;;  %v1772_v61 = vld [vmem:[%s2990_s2 + $0x8] sm:$0xff] }
  0xbf   : > { %480 = vmatprep.mubr.f32.mxu1 %v2396_v18 }
  0xc2   : > { %1990 = vmatmul.mubr.msk.f32.gmra.mrb[2].mxu1 %vm252_vm4, %v222_v62  ;;  %v2004_v62 = vld [vmem:[%s2989_s1 + $0xb8] sm:$0xff] }
  0xc3   : > { %486 = vmatprep.mubr.f32.mxu1 %v2396_v18 }
  0xc6   : > { %1991 = vmatmul.mubr.msk.f32.gmra.mrb[16].mxu1 %vm252_vm4, %v223_v63  ;;  %v1774_v63 = vld [vmem:[%s2990_s2 + $0x28] sm:$0xff] }
  0xc7   : > { %490 = vmatprep.mubr.f32.mxu1 %v2396_v18 }
  0xca   : > { %1992 = vmatmul.mubr.msk.f32.gmra.mrb[18].mxu1 %vm252_vm4, %v224_v0  ;;  %v2065_v0 = vld [vmem:[%s2989_s1 + $0x1a0] sm:$0xff] }
  0xcb   : > { %494 = vmatprep.mubr.f32.mxu1 %v2396_v18 }
  0xce   : > { %1993 = vmatmul.mubr.msk.f32.gmra.mrb[8].mxu1 %vm252_vm4, %v225_v1  ;;  %v1773_v1 = vld [vmem:[%s2990_s2 + $0x20] sm:$0xff] }
  0xcf   : > { %500 = vmatprep.mubr.f32.mxu1 %v2396_v18 }
  0xd2   : > { %1994 = vmatmul.mubr.msk.f32.gmra.mrb[10].mxu1 %vm252_vm4, %v226_v2  ;;  %v1776_v2 = vld [vmem:[%s2990_s2 + $0x38] sm:$0xff] }
  0xd3   : > { %506 = vmatprep.mubr.f32.mxu1 %v2396_v18 }
  0xd6   : > { %1995 = vmatmul.mubr.msk.f32.gmra.mrb[12].mxu1 %vm252_vm4, %v227_v3  ;;  %v2066_v3 = vld [vmem:[%s2989_s1 + $0x1a8] sm:$0xff] }
  0xd7   : > { %512 = vmatprep.mubr.f32.mxu1 %v2396_v18 }
  0xda   : > { %1996 = vmatmul.mubr.msk.f32.gmra.mrb[14].mxu1 %vm252_vm4, %v228_v4  ;;  %v1775_v4 = vld [vmem:[%s2990_s2 + $0x30] sm:$0xff] }
  0xdb   : > { %662 = vmatprep.mubr.f32.mxu1 %v2396_v18 }
 0x102   : > { %v1095_v5 = vpop.permute.xlu1 %1094 }
 0x103   : > { %v1093_v6 = vpop.permute.xlu0 %1092 }
 0x104   : > { %v1098_v7 = vsel %vm1096_vm6, %v1093_v6, %v1095_v5  ;;  %v2067_v5 = vld [vmem:[%s2989_s1 + $0x1b0] sm:$0xff] }
 0x105   : > { %1125 = vmatprep.subr.mxu0 %v1098_v7  ;;  %v2077_v7 = vld [vmem:[%s2989_s1 + $0x1c0] sm:$0xff] }
 0x106   : > { %v722_v8 = vpop.permute.xlu1 %721 }
 0x107   : > { %v1091_v9 = vpop.permute.xlu0 %1090  ;;  %v730_v27 = vmul.f32 %v722_v8, %v2509_v17 }
 0x108   : > { %v1097_v11 = vsel %vm1096_vm6, %v1091_v9, %v1093_v6  ;;  %v2068_v6 = vld [vmem:[%s2989_s1 + $0x1b8] sm:$0xff]  ;;  %v2079_v9 = vld [vmem:[%s2989_s1 + $0x1d0] sm:$0xff] }
 0x109   : > { %1126 = vmatpush1.msra.mxu0 %v1097_v11  ;;  %v2081_v11 = vld [vmem:[%s2989_s1 + $0x1e0] sm:$0xff] }
 0x10a   : > { %v1271_v12 = vpop.permute.xlu1 %1270  ;;  %2053 = vmatmul.mubr.msk.f32.vlgmr.msra.gmra.mrb[0].mxu0 %vm252_vm4, %v2045_v10  ;;  %v2080_v10 = vld [vmem:[%s2989_s1 + $0x1d8] sm:$0xff] }
 0x10b   : > { %v724_v13 = vpop.permute.xlu0 %723  ;;  %1195 = vmatprep.mubr.f32.mxu0 %v2396_v18 }
 0x10c   : > { %v726_v19 = vsel %vm725_vm7, %v722_v8, %v724_v13  ;;  %v732_v20 = vmul.f32 %v724_v13, %v2503_v16  ;;  %v2078_v8 = vld [vmem:[%s2989_s1 + $0x1c8] sm:$0xff]  ;;  %v2083_v13 = vld [vmem:[%s2989_s1 + $0x1f0] sm:$0xff] }
 0x10d   : > { %v731_v21 = vmul.f32 %v726_v19, %v2501_v15 }
 0x10e   : > { %749 = vrot.lane.b32.xlu1 %v732_v20, %s2403_s20  ;;  %v1273_v22 = vpop.permute.xlu1 %1272  ;;  %2054 = vmatmul.mubr.msk.f32.gmra.mrb[2].mxu0 %vm252_vm4, %v2046_v14  ;;  %v2084_v14 = vld [vmem:[%s2989_s1 + $0x1f8] sm:$0xff] }
 0x10f   : > { %v1277_v23 = vsel %vm1276_vm8, %v1271_v12, %v1273_v22  ;;  %747 = vrot.lane.b32.xlu0 %v731_v21, %s2403_s20  ;;  %v1275_v24 = vpop.permute.xlu0 %1274  ;;  %1201 = vmatprep.mubr.f32.mxu0 %v2396_v18  ;;  %v2082_v12 = vld [vmem:[%s2989_s1 + $0x1e8] sm:$0xff] }
 0x110   : > { %v1278_v25 = vsel %vm1276_vm8, %v1273_v22, %v1275_v24 }
 0x111   : > { %1305 = vmatprep.subr.mxu0 %v1278_v25 }
 0x112   : > { %v1594_v28 = vpop.permute.xlu1 %1593  ;;  %1306 = vmatpush1.msra.mxu0 %v1277_v23 }
 0x113   : > { %v1602_v29 = vmul.f32 %v1594_v28, %v2503_v16  ;;  %745 = vrot.lane.b32.xlu0 %v730_v27, %s2403_s20  ;;  %v1592_v30 = vpop.permute.xlu0 %1591  ;;  %2055 = vmatmul.mubr.msk.f32.gmra.mrb[8].mxu0 %vm252_vm4, %v2047_v26 }
 0x114   : > { %v1596_v31 = vsel %vm1595_vm9, %v1592_v30, %v1594_v28  ;;  %1205 = vmatprep.mubr.f32.mxu0 %v2396_v18  ;;  %v1600_v36 = vmul.f32 %v1592_v30, %v2509_v17  ;;  %v1997_v17 = vld [vmem:[%s2989_s1 + $0x80] sm:$0xff] }
 0x115   : > { %v1601_v32 = vmul.f32 %v1596_v31, %v2501_v15  ;;  %v2049_v15 = vld [vmem:[%s2989_s1 + $0x160] sm:$0xff] }
 0x116   : > { %v568_v35 = vpop.permute.xlu1 %567  ;;  %v2013_v31 = vld [vmem:[%s2989_s1 + $0xc0] sm:$0xff] }
 0x117   : > { %1617 = vrot.lane.b32.xlu1 %v1601_v32, %s2404_s29  ;;  %1619 = vrot.lane.b32.xlu0 %v1602_v29, %s2404_s29  ;;  %v566_v16 = vpop.permute.xlu0 %565 }
 0x118   : > { %2056 = vmatmul.mubr.msk.f32.gmra.mrb[10].mxu0 %vm252_vm4, %v2048_v33  ;;  %v571_v37 = vsel %vm569_vm10, %v566_v16, %v568_v35 }
 0x119   : > { %1209 = vmatprep.mubr.f32.mxu0 %v2396_v18  ;;  %598 = vmatprep.subr.mxu1 %v571_v37 }
 0x11a   : > { %v1438_v42 = vpop.permute.xlu1 %1437 }
 0x11b   : > { %1615 = vrot.lane.b32.xlu1 %v1600_v36, %s2404_s29  ;;  %v564_v38 = vpop.permute.xlu0 %563  ;;  %1779 = vperm.xlu0 %2277, %v1771_v58   ;;  %v2014_v36 = vld [vmem:[%s2989_s1 + $0xc8] sm:$0xff]  ;;  %s190_s29 = scalar_lea.vmem [#allocation2], %s1971_s27 }
 0x11c   : > { %2057 = vmatmul.mubr.msk.f32.gmra.mrb[12].mxu0 %vm252_vm4, %v2049_v15  ;;  %v570_v39 = vsel %vm569_vm10, %v564_v38, %v566_v16  ;;  %v2016_v38 = vld [vmem:[%s2989_s1 + $0xd8] sm:$0xff]  ;;  %s1905_s30 = sshll.u32 %s190_s29, 4  ;;  %s2944_s30 = int_to_ptr.vmem [resolvable:$true] %s1905_s30 }
 0x11d   : > { %1215 = vmatprep.mubr.f32.mxu0 %v2396_v18  ;;  %599 = vmatpush1.msra.mxu1 %v570_v39  ;;  %v2017_v39 = vld [vmem:[%s2989_s1 + $0xe0] sm:$0xff]  ;;  %s2327_s8 = scalar_lea.vmem %s2944_s30, 512  ;;  %p2334_p0 = scmp.lt.s32.totalorder %s2944_s30, %s2332_s10 }
 0x11e   : > { %2005 = vmatmul.mubr.msk.f32.vlgmr.msra.gmra.mrb[0].mxu1 %vm252_vm4, %v1997_v17  ;;  %v1436_v49 = vpop.permute.xlu1 %1435  ;;  %v2094_v17 = vld [vmem:[%s2989_s1 + $0x208] sm:$0xff]  ;;  %p2328_p11 = scmp.ne.s32.totalorder %s2944_s30, %s2327_s8  ;;  %p2335_p1 = scmp.lt.s32.totalorder %s2333_s11, %s2327_s8 }
 0x11f   : > { %668 = vmatprep.mubr.f32.mxu1 %v2396_v18  ;;  %v1440_v43 = vpop.permute.xlu0 %1439  ;;  %v1442_v52 = vsel %vm1441_vm11, %v1436_v49, %v1438_v42  ;;  %1784 = vperm.xlu1 %2278, %v1772_v61  }
 0x120   : > { %2058 = vmatmul.mubr.msk.f32.gmra.mrb[14].mxu0 %vm252_vm4, %v2050_v40  ;;  %v1443_v45 = vsel %vm1441_vm11, %v1438_v42, %v1440_v43  ;;  %1794 = vperm.xlu0 %2277, %v1774_v63   ;;  %v2095_v40 = vld [vmem:[%s2989_s1 + $0x210] sm:$0xff]  ;;  %v2018_v42 = vld [vmem:[%s2989_s1 + $0xe8] sm:$0xff]  ;;  %v2096_v43 = vld [vmem:[%s2989_s1 + $0x218] sm:$0xff]  ;;  %p2329_p12 = pnand %p2328_p11, %p2471_p5  ;;  %p2336_p2 = por %p2335_p1, %p2334_p0 }
 0x121   : > { %1221 = vmatprep.mubr.f32.mxu0 %v2396_v18  ;;  %1470 = vmatprep.subr.mxu0 %v1443_v45 }
 0x122   : > { %2006 = vmatmul.mubr.msk.f32.gmra.mrb[2].mxu1 %vm252_vm4, %v1998_v44  ;;  %p2330_p13 = pneg %p2329_p12 }
 0x123   : > { %674 = vmatprep.mubr.f32.mxu1 %v2396_v18  ;;  %1789 = vperm.xlu1 %2278, %v1773_v1  }
 0x124   : > { %2059 = vmatmul.mubr.msk.f32.gmra.mrb[16].mxu0 %vm252_vm4, %v2051_v46  ;;  %1804 = vperm.xlu0 %2277, %v1776_v2   ;;  %v2019_v46 = vld [vmem:[%s2989_s1 + $0xf0] sm:$0xff]  ;;  %p2337_p3 = pnand %p2336_p2, %p2330_p13 }
 0x125   : > { %1227 = vmatprep.mubr.f32.mxu0 %v2396_v18 }
 0x126   : > { %2007 = vmatmul.mubr.msk.f32.gmra.mrb[20].mxu1 %vm252_vm4, %v1999_v47  ;;  %v2097_v47 = vld [vmem:[%s2989_s1 + $0x220] sm:$0xff] }
 0x127   : > { %678 = vmatprep.mubr.f32.mxu1 %v2396_v18  ;;  %1799 = vperm.xlu1 %2278, %v1775_v4  }
 0x128   : > { %2060 = vmatmul.mubr.msk.f32.gmra.mrb[18].mxu0 %vm252_vm4, %v2052_v48 }
 0x129   : > { %1369 = vmatprep.mubr.f32.mxu0 %v2396_v18 }
 0x12a   : > { %2008 = vmatmul.mubr.msk.f32.gmra.mrb[22].mxu1 %vm252_vm4, %v2000_v50  ;;  %v2020_v50 = vld [vmem:[%s2989_s1 + $0xf8] sm:$0xff] }
 0x12b   : > { %682 = vmatprep.mubr.f32.mxu1 %v2396_v18 }
 0x12c   : > { %2069 = vmatmul.mubr.msk.f32.vlgmr.msra.gmra.mrb[0].mxu0 %vm252_vm4, %v2061_v51  ;;  %v2098_v51 = vld [vmem:[%s2989_s1 + $0x228] sm:$0xff] }
 0x12d   : > { %1375 = vmatprep.mubr.f32.mxu0 %v2396_v18  ;;  %1471 = vmatpush1.msra.mxu0 %v1442_v52  ;;  %v2033_v52 = vld [vmem:[%s2989_s1 + $0x120] sm:$0xff] }
 0x12e   : > { %2009 = vmatmul.mubr.msk.f32.gmra.mrb[8].mxu1 %vm252_vm4, %v2001_v53  ;;  %v2099_v53 = vld [vmem:[%s2989_s1 + $0x230] sm:$0xff] }
 0x12f   : > { %688 = vmatprep.mubr.f32.mxu1 %v2396_v18 }
 0x130   : > { %2070 = vmatmul.mubr.msk.f32.gmra.mrb[2].mxu0 %vm252_vm4, %v2062_v54  ;;  %v2034_v54 = vld [vmem:[%s2989_s1 + $0x128] sm:$0xff] }
 0x131   : > { %1381 = vmatprep.mubr.f32.mxu0 %v2396_v18 }
 0x132   : > { %2010 = vmatmul.mubr.msk.f32.gmra.mrb[10].mxu1 %vm252_vm4, %v2002_v55  ;;  %v2100_v55 = vld [vmem:[%s2989_s1 + $0x238] sm:$0xff] }
 0x133   : > { %694 = vmatprep.mubr.f32.mxu1 %v2396_v18 }
 0x134   : > { %2071 = vmatmul.mubr.msk.f32.gmra.mrb[20].mxu0 %vm252_vm4, %v2063_v56  ;;  %v2035_v56 = vld [vmem:[%s2989_s1 + $0x130] sm:$0xff] }
 0x135   : > { %1385 = vmatprep.mubr.f32.mxu0 %v2396_v18 }
 0x136   : > { %2011 = vmatmul.mubr.msk.f32.gmra.mrb[12].mxu1 %vm252_vm4, %v2003_v57  ;;  %v2036_v57 = vld [vmem:[%s2989_s1 + $0x138] sm:$0xff] }
 0x137   : > { %700 = vmatprep.mubr.f32.mxu1 %v2396_v18 }
 0x138   : > { %2072 = vmatmul.mubr.msk.f32.gmra.mrb[22].mxu0 %vm252_vm4, %v2064_v59 }
 0x139   : > { %1389 = vmatprep.mubr.f32.mxu0 %v2396_v18 }
 0x13a   : > { %2012 = vmatmul.mubr.msk.f32.gmra.mrb[14].mxu1 %vm252_vm4, %v2004_v62 }
 0x13b   : > { %844 = vmatprep.mubr.f32.mxu1 %v2396_v18 }
 0x13c   : > { %2073 = vmatmul.mubr.msk.f32.gmra.mrb[12].mxu0 %vm252_vm4, %v2065_v0 }
 0x13d   : > { %1395 = vmatprep.mubr.f32.mxu0 %v2396_v18 }
 0x140   : > { %2074 = vmatmul.mubr.msk.f32.gmra.mrb[14].mxu0 %vm252_vm4, %v2066_v3 }
 0x141   : > { %1401 = vmatprep.mubr.f32.mxu0 %v2396_v18 }
 0x144   : > { %2075 = vmatmul.mubr.msk.f32.gmra.mrb[16].mxu0 %vm252_vm4, %v2067_v5 }
 0x145   : > { %1407 = vmatprep.mubr.f32.mxu0 %v2396_v18 }
 0x148   : > { %2076 = vmatmul.mubr.msk.f32.gmra.mrb[18].mxu0 %vm252_vm4, %v2068_v6 }
 0x149   : > { %1534 = vmatprep.mubr.f32.mxu0 %v2396_v18 }
 0x14c   : > { %2085 = vmatmul.mubr.msk.f32.vlgmr.msra.gmra.mrb[0].mxu0 %vm252_vm4, %v2077_v7 }
 0x14d   : > { %1540 = vmatprep.mubr.f32.mxu0 %v2396_v18 }
 0x150   : > { %2086 = vmatmul.mubr.msk.f32.gmra.mrb[2].mxu0 %vm252_vm4, %v2078_v8 }
 0x151   : > { %1546 = vmatprep.mubr.f32.mxu0 %v2396_v18 }
 0x154   : > { %2087 = vmatmul.mubr.msk.f32.gmra.mrb[24].mxu0 %vm252_vm4, %v2079_v9 }
 0x155   : > { %1550 = vmatprep.mubr.f32.mxu0 %v2396_v18 }
 0x158   : > { %2088 = vmatmul.mubr.msk.f32.gmra.mrb[26].mxu0 %vm252_vm4, %v2080_v10 }
 0x159   : > { %1554 = vmatprep.mubr.f32.mxu0 %v2396_v18 }
 0x15c   : > { %2089 = vmatmul.mubr.msk.f32.gmra.mrb[12].mxu0 %vm252_vm4, %v2081_v11 }
 0x15d   : > { %1560 = vmatprep.mubr.f32.mxu0 %v2396_v18 }
 0x160   : > { %2090 = vmatmul.mubr.msk.f32.gmra.mrb[14].mxu0 %vm252_vm4, %v2082_v12 }
 0x161   : > { %1566 = vmatprep.mubr.f32.mxu0 %v2396_v18 }
 0x164   : > { %2091 = vmatmul.mubr.msk.f32.gmra.mrb[16].mxu0 %vm252_vm4, %v2083_v13 }
 0x165   : > { %1572 = vmatprep.mubr.f32.mxu0 %v2396_v18 }
 0x168   : > { %2092 = vmatmul.mubr.msk.f32.gmra.mrb[18].mxu0 %vm252_vm4, %v2084_v14 }
 0x169   : > { %1714 = vmatprep.mubr.f32.mxu0 %v2396_v18 }
 0x177   : > { %v1023_v19 = vpop.f32.mrb[4].mxu0 }
 0x178   : > { %v1024_v20 = vpop.f32.mrb[5].mxu0 }
 0x179   : > { %v355_v21 = vpop.f32.mrb[4].mxu1 }
 0x17a   : > { %v356_v22 = vpop.f32.mrb[5].mxu1 }
 0x17b   : > { %v1027_v23 = vpop.f32.mrb[6].mxu0 }
 0x17c   : > { %v1028_v24 = vpop.f32.mrb[7].mxu0 }
 0x17d   : > { %v359_v25 = vpop.f32.mrb[6].mxu1 }
 0x17e   : > { %v360_v26 = vpop.f32.mrb[7].mxu1 }
 0x180   : > { %v750_v27 = vpop.permute.xlu1 %749 }
 0x181   : > { %v748_v28 = vpop.permute.xlu0 %747 }
 0x182   : > { %v753_v29 = vsel %vm751_vm12, %v748_v28, %v750_v27 }
 0x183   : > { %780 = vmatprep.subr.mxu1 %v753_v29 }
 0x185   : > { %v746_v30 = vpop.permute.xlu0 %745 }
 0x186   : > { %v752_v32 = vsel %vm751_vm12, %v746_v30, %v748_v28 }
 0x187   : > { %781 = vmatpush1.msra.mxu1 %v752_v32 }
 0x188   : > { %2021 = vmatmul.mubr.msk.f32.vlgmr.msra.gmra.mrb[0].mxu1 %vm252_vm4, %v2013_v31  ;;  %2123 = vmatprep.subr.mxu1 %v2525_v34  ;;  %v2015_v34 = vld [vmem:[%s2989_s1 + $0xd0] sm:$0xff] }
 0x189   : > { %v1618_v33 = vpop.permute.xlu1 %1617  ;;  %2124 = vmatpush1.msra.mxu1 %v2537_v41  ;;  %850 = vmatprep.mubr.f32.mxu1 %v2396_v18  ;;  %v1620_v35 = vpop.permute.xlu0 %1619  ;;  %v2093_v41 = vld [vmem:[%s2989_s1 + $0x200] sm:$0xff] }
 0x18a   : > { %v1623_v16 = vsel %vm1621_vm13, %v1618_v33, %v1620_v35 }
 0x18b   : > { %1650 = vmatprep.subr.mxu0 %v1623_v16 }
 0x18c   : > { %2022 = vmatmul.mubr.msk.f32.gmra.mrb[2].mxu1 %vm252_vm4, %v2014_v36 }
 0x18d   : > { %v1616_v37 = vpop.permute.xlu1 %1615  ;;  %856 = vmatprep.mubr.f32.mxu1 %v2396_v18 }
 0x18e   : > { %v1622_v15 = vsel %vm1621_vm13, %v1616_v37, %v1618_v33 }
 0x18f   : > { %1651 = vmatpush1.msra.mxu0 %v1622_v15 }
 0x190   : > { %2023 = vmatmul.mubr.msk.f32.gmra.mrb[24].mxu1 %vm252_vm4, %v2015_v34  ;;  %2101 = vmatmul.mubr.msk.f32.vlgmr.msra.gmra.mrb[0].mxu0 %vm252_vm4, %v2093_v41 }
 0x191   : > { %860 = vmatprep.mubr.f32.mxu1 %v2396_v18  ;;  %1720 = vmatprep.mubr.f32.mxu0 %v2396_v18 }
 0x194   : > { %2024 = vmatmul.mubr.msk.f32.gmra.mrb[26].mxu1 %vm252_vm4, %v2016_v38  ;;  %2102 = vmatmul.mubr.msk.f32.gmra.mrb[2].mxu0 %vm252_vm4, %v2094_v17 }
 0x195   : > { %864 = vmatprep.mubr.f32.mxu1 %v2396_v18  ;;  %1726 = vmatprep.mubr.f32.mxu0 %v2396_v18 }
 0x198   : > { %2025 = vmatmul.mubr.msk.f32.gmra.mrb[8].mxu1 %vm252_vm4, %v2017_v39  ;;  %2103 = vmatmul.mubr.msk.f32.gmra.mrb[28].mxu0 %vm252_vm4, %v2095_v40 }
 0x199   : > { %870 = vmatprep.mubr.f32.mxu1 %v2396_v18  ;;  %1730 = vmatprep.mubr.f32.mxu0 %v2396_v18  ;;  %v488_v44 = vpop.f32.mrb[16].mxu1 }
 0x19a   : > { %v489_v45 = vpop.f32.mrb[17].mxu1  ;;  %v1780_v23 = vpop.permute.xlu0 %1779 }
 0x19c   : > { %2026 = vmatmul.mubr.msk.f32.gmra.mrb[10].mxu1 %vm252_vm4, %v2018_v42  ;;  %2104 = vmatmul.mubr.msk.f32.gmra.mrb[30].mxu0 %vm252_vm4, %v2096_v43 }
 0x19d   : > { %876 = vmatprep.mubr.f32.mxu1 %v2396_v18  ;;  %1734 = vmatprep.mubr.f32.mxu0 %v2396_v18  ;;  %v492_v48 = vpop.f32.mrb[18].mxu1 }
 0x19e   : > { %v493_v49 = vpop.f32.mrb[19].mxu1  ;;  %v1785_v35 = vpop.permute.xlu1 %1784 }
 0x1a0   : > { %2027 = vmatmul.mubr.msk.f32.gmra.mrb[12].mxu1 %vm252_vm4, %v2019_v46  ;;  %2105 = vmatmul.mubr.msk.f32.gmra.mrb[12].mxu0 %vm252_vm4, %v2097_v47 }
 0x1a1   : > { %882 = vmatprep.mubr.f32.mxu1 %v2396_v18  ;;  %1740 = vmatprep.mubr.f32.mxu0 %v2396_v18 }
 0x1a4   : > { %2028 = vmatmul.mubr.msk.f32.gmra.mrb[14].mxu1 %vm252_vm4, %v2020_v50  ;;  %2106 = vmatmul.mubr.msk.f32.gmra.mrb[14].mxu0 %vm252_vm4, %v2098_v51  ;;  %v1790_v51 = vpop.permute.xlu1 %1789 }
 0x1a5   : > { %1029 = vmatprep.mubr.f32.mxu1 %v2396_v18  ;;  %1746 = vmatprep.mubr.f32.mxu0 %v2396_v18 }
 0x1a8   : > { %2041 = vmatmul.mubr.msk.f32.vlgmr.msra.gmra.mrb[8].mxu1 %vm252_vm4, %v2033_v52  ;;  %2107 = vmatmul.mubr.msk.f32.gmra.mrb[16].mxu0 %vm252_vm4, %v2099_v53 }
 0x1a9   : > { %1035 = vmatprep.mubr.f32.mxu1 %v2396_v18  ;;  %1752 = vmatprep.mubr.f32.mxu0 %v2396_v18 }
 0x1ac   : > { %2042 = vmatmul.mubr.msk.f32.gmra.mrb[10].mxu1 %vm252_vm4, %v2034_v54  ;;  %2108 = vmatmul.mubr.msk.f32.gmra.mrb[18].mxu0 %vm252_vm4, %v2100_v55 }
 0x1ad   : > { %1041 = vmatprep.mubr.f32.mxu1 %v2396_v18 }
 0x1b0   : > { %2043 = vmatmul.mubr.msk.f32.gmra.mrb[12].mxu1 %vm252_vm4, %v2035_v56 }
 0x1b1   : > { %1047 = vmatprep.mubr.f32.mxu1 %v2396_v18 }
 0x1b4   : > { %2044 = vmatmul.mubr.msk.f32.gmra.mrb[14].mxu1 %vm252_vm4, %v2036_v57 }
 0x1e6   : > { %v1203_v58 = vpop.f32.mrb[8].mxu0 }
 0x1e7   : > { %v1204_v59 = vpop.f32.mrb[9].mxu0 }
 0x1eb   : > { %v1207_v60 = vpop.f32.mrb[10].mxu0 }
 0x1ec   : > { %v1208_v61 = vpop.f32.mrb[11].mxu0 }
 0x1f9   : > { %v676_v62 = vpop.f32.mrb[20].mxu1 }
 0x1fa   : > { %v677_v63 = vpop.f32.mrb[21].mxu1 }
 0x1fd   : > { %v680_v0 = vpop.f32.mrb[22].mxu1 }
 0x1fe   : > { %v681_v1 = vpop.f32.mrb[23].mxu1 }
 0x1ff   : > { %v1795_v1 = vpop.permute.xlu0 %1794 }
 0x207   : > { %v1383_v2 = vpop.f32.mrb[20].mxu0 }
 0x208   : > { %v1384_v3 = vpop.f32.mrb[21].mxu0 }
 0x20b   : > { %v1387_v4 = vpop.f32.mrb[22].mxu0 }
 0x20c   : > { %v1388_v5 = vpop.f32.mrb[23].mxu0 }
 0x227   : > { %v1548_v6 = vpop.f32.mrb[24].mxu0 }
 0x228   : > { %v1549_v18 = vpop.f32.mrb[25].mxu0 }
 0x22b   : > { %v1552_v7 = vpop.f32.mrb[26].mxu0 }
 0x22c   : > { %v1553_v8 = vpop.f32.mrb[27].mxu0 }
 0x25b   : > { %v846_v9 = vpop.f32.mrb[0].mxu1 }
 0x25c   : > { %v848_v10 = vpop.f32.mrb[1].mxu1 }
 0x25f   : > { %v852_v11 = vpop.f32.mrb[2].mxu1 }
 0x260   : > { %v854_v12 = vpop.f32.mrb[3].mxu1 }
 0x263   : > { %v1716_v13 = vpop.f32.mrb[0].mxu0  ;;  %v858_v14 = vpop.f32.mrb[24].mxu1 }
 0x264   : > { %v2125_v19 = vadd.f32 %v1716_v13, %v846_v9  ;;  %v1718_v20 = vpop.f32.mrb[1].mxu0  ;;  %v859_v21 = vpop.f32.mrb[25].mxu1 }
 0x265   : > { %v2126_v22 = vadd.f32 %v1718_v20, %v848_v10 }
 0x266   : > { %v1807_v30 = vadd.f32 %v2125_v19, %v1780_v23 }
 0x267   : > { %v1722_v24 = vpop.f32.mrb[2].mxu0  ;;  %v862_v25 = vpop.f32.mrb[26].mxu1  ;;  %v1808_v32 = vadd.f32 %v2126_v22, %v1780_v23 }
 0x268   : > { %v2127_v26 = vadd.f32 %v1722_v24, %v852_v11  ;;  %v1724_v27 = vpop.f32.mrb[3].mxu0  ;;  %v863_v28 = vpop.f32.mrb[27].mxu1  ;;  %v2109_v36 = vmul.f32 -1.442695, %v1807_v30 }
 0x269   : > { %v2128_v29 = vadd.f32 %v1724_v27, %v854_v12  ;;  %v2110_v37 = vmul.f32 -1.442695, %v1808_v32  ;;  %v1800_v11 = vpop.permute.xlu1 %1799  ;;  %v1805_v24 = vpop.permute.xlu0 %1804 }
 0x26a   : > { %v1809_v41 = vadd.f32 %v2127_v26, %v1785_v35  ;;  %2279 = vpow2.f32 %v2109_v36 }
 0x26b   : > { %v1728_v31 = vpop.f32.mrb[28].mxu0  ;;  %v1810_v15 = vadd.f32 %v2128_v29, %v1785_v35  ;;  %2281 = vpow2.f32 %v2110_v37 }
 0x26c   : > { %v1729_v33 = vpop.f32.mrb[29].mxu0  ;;  %v2111_v39 = vmul.f32 -1.442695, %v1809_v41 }
 0x26d   : > { %v2112_v40 = vmul.f32 -1.442695, %v1810_v15 }
 0x26e   : > { %2283 = vpow2.f32 %v2111_v39 }
 0x26f   : > { %v1732_v16 = vpop.f32.mrb[30].mxu0  ;;  %2285 = vpow2.f32 %v2112_v40 }
 0x270   : > { %v1733_v34 = vpop.f32.mrb[31].mxu0 }
 0x273   : > { %v1736_v38 = vpop.f32.mrb[12].mxu0 }
 0x274   : > { %v1738_v17 = vpop.f32.mrb[13].mxu0  ;;  %v2280_v49 = vpop.eup %2279 }
 0x275   : > { %v2282_v52 = vpop.eup %2281  ;;  %v1831_v57 = vadd.f32 1.0, %v2280_v49 }
 0x276   : > { %v1832_v62 = vadd.f32 1.0, %v2282_v52 }
 0x277   : > { %v1742_v42 = vpop.f32.mrb[14].mxu0 }
 0x278   : > { %v1744_v43 = vpop.f32.mrb[15].mxu0  ;;  %v2284_v3 = vpop.eup %2283 }
 0x279   : > { %v2286_v6 = vpop.eup %2285  ;;  %v1833_v12 = vadd.f32 1.0, %v2284_v3 }
 0x27a   : > { %v1834_v14 = vadd.f32 1.0, %v2286_v6 }
 0x27b   : > { %v1031_v44 = vpop.f32.mrb[8].mxu1  ;;  %v1748_v45 = vpop.f32.mrb[16].mxu0 }
 0x27c   : > { %v2129_v46 = vadd.f32 %v1736_v38, %v1031_v44  ;;  %v1033_v47 = vpop.f32.mrb[9].mxu1  ;;  %v1750_v48 = vpop.f32.mrb[17].mxu0 }
 0x27d   : > { %v2130_v50 = vadd.f32 %v1738_v17, %v1033_v47 }
 0x27e   : > { %v1811_v53 = vadd.f32 %v2129_v46, %v1790_v51 }
 0x27f   : > { %v1812_v54 = vadd.f32 %v2130_v50, %v1790_v51  ;;  %v1037_v55 = vpop.f32.mrb[10].mxu1  ;;  %v1754_v56 = vpop.f32.mrb[18].mxu0 }
 0x280   : > { %v2113_v58 = vmul.f32 -1.442695, %v1811_v53  ;;  %v2131_v59 = vadd.f32 %v1742_v42, %v1037_v55  ;;  %v1039_v60 = vpop.f32.mrb[11].mxu1  ;;  %v1756_v61 = vpop.f32.mrb[19].mxu0 }
 0x281   : > { %v2114_v63 = vmul.f32 -1.442695, %v1812_v54  ;;  %v2132_v0 = vadd.f32 %v1744_v43, %v1039_v60 }
 0x282   : > { %2287 = vpow2.f32 %v2113_v58  ;;  %v1813_v2 = vadd.f32 %v2131_v59, %v1795_v1 }
 0x283   : > { %2289 = vpow2.f32 %v2114_v63  ;;  %v1814_v4 = vadd.f32 %v2132_v0, %v1795_v1  ;;  %v1043_v5 = vpop.f32.mrb[12].mxu1 }
 0x284   : > { %2291 = vrcp.f32 %v1831_v57  ;;  %v2115_v18 = vmul.f32 -1.442695, %v1813_v2  ;;  %v2133_v7 = vadd.f32 %v1748_v45, %v1043_v5  ;;  %v1045_v8 = vpop.f32.mrb[13].mxu1 }
 0x285   : > { %2293 = vrcp.f32 %v1832_v62  ;;  %v2116_v9 = vmul.f32 -1.442695, %v1814_v4  ;;  %v2134_v10 = vadd.f32 %v1750_v48, %v1045_v8 }
 0x286   : > { %2295 = vpow2.f32 %v2115_v18  ;;  %v1815_v13 = vadd.f32 %v2133_v7, %v1800_v11 }
 0x287   : > { %2297 = vpow2.f32 %v2116_v9  ;;  %v1816_v19 = vadd.f32 %v2134_v10, %v1800_v11  ;;  %v1049_v20 = vpop.f32.mrb[14].mxu1 }
 0x288   : > { %2299 = vtanh.f32 %v1815_v13  ;;  %v2135_v21 = vadd.f32 %v1754_v56, %v1049_v20  ;;  %v1051_v22 = vpop.f32.mrb[15].mxu1 }
 0x289   : > { %2301 = vtanh.f32 %v1816_v19  ;;  %v2136_v23 = vadd.f32 %v1756_v61, %v1051_v22 }
 0x28a   : > { %2303 = vrcp.f32 %v1833_v12  ;;  %v1817_v25 = vadd.f32 %v2135_v21, %v1805_v24 }
 0x28b   : > { %2305 = vrcp.f32 %v1834_v14  ;;  %v1818_v26 = vadd.f32 %v2136_v23, %v1805_v24 }
 0x28c   : > { %v2288_v27 = vpop.eup %2287  ;;  %2307 = vtanh.f32 %v1817_v25 }
 0x28d   : > { %v2290_v28 = vpop.eup %2289  ;;  %2309 = vtanh.f32 %v1818_v26  ;;  %v1855_v31 = vadd.f32 1.0, %v2288_v27 }
 0x28e   : > { %v2292_v29 = vpop.eup %2291  ;;  %v1856_v33 = vadd.f32 1.0, %v2290_v28 }
 0x28f   : > { %v2294_v30 = vpop.eup %2293  ;;  %2311 = vrcp.f32 %v1855_v31 }
 0x290   : > { %v2296_v32 = vpop.eup %2295  ;;  %2313 = vrcp.f32 %v1856_v33 }
 0x291   : > { %v2298_v35 = vpop.eup %2297  ;;  %v1857_v37 = vadd.f32 1.0, %v2296_v32 }
 0x292   : > { %v2300_v36 = vpop.eup %2299  ;;  %v1858_v15 = vadd.f32 1.0, %v2298_v35 }
 0x293   : > { %v2302_v16 = vpop.eup %2301  ;;  %v1871_v34 = vmul.f32 %v2300_v36, %v2292_v29 }
 0x294   : > { %v2304_v41 = vpop.eup %2303  ;;  %v1872_v38 = vmul.f32 %v2302_v16, %v2294_v30 }
 0x295   : > { %v2306_v17 = vpop.eup %2305  ;;  %2315 = vtanh.f32 %v1871_v34 }
 0x296   : > { %v2308_v39 = vpop.eup %2307  ;;  %2317 = vtanh.f32 %v1872_v38 }
 0x297   : > { %v2310_v40 = vpop.eup %2309  ;;  %2319 = vrcp.f32 %v1857_v37  ;;  %v1873_v42 = vmul.f32 %v2308_v39, %v2304_v41 }
 0x298   : > { %2321 = vrcp.f32 %v1858_v15  ;;  %v1874_v43 = vmul.f32 %v2310_v40, %v2306_v17 }
 0x299   : > { %2323 = vtanh.f32 %v1873_v42  ;;  %v2312_v44 = vpop.eup %2311 }
 0x29a   : > { %2325 = vtanh.f32 %v1874_v43  ;;  %v2314_v45 = vpop.eup %2313 }
 0x29f   : > { %v2316_v46 = vpop.eup %2315 }
 0x2a0   : > { %v2318_v47 = vpop.eup %2317  ;;  %v1879_v48 = vmul.f32 %v2316_v46, %v2312_v44 }
 0x2a1   : > { %v2320_v49 = vpop.eup %2319  ;;  %v1880_v50 = vmul.f32 %v2318_v47, %v2314_v45 }
 0x2a2   : > { %v2322_v51 = vpop.eup %2321  ;;  %v1883_v52 = vmax.f32 %v1879_v48, 0.0 }
 0x2a3   : > { %v2324_v53 = vpop.eup %2323  ;;  %v1884_v54 = vmax.f32 %v1880_v50, 0.0 }
 0x2a4   : > { %v2326_v55 = vpop.eup %2325  ;;  %v1881_v56 = vmul.f32 %v2324_v53, %v2320_v49  ;;  %1887 = vst [vmem:[%s190_s29] sm:$0xff] %v1883_v52 }
 0x2a5   : > { %v1882_v57 = vmul.f32 %v2326_v55, %v2322_v51  ;;  %1888 = vst [vmem:[%s190_s29 + $0x8] sm:$0xff] %v1884_v54 }
 0x2a6   : > { %v1885_v58 = vmax.f32 %v1881_v56, 0.0 }
 0x2a7   : > { %v1886_v59 = vmax.f32 %v1882_v57, 0.0 }
 0x2a8   : > { %1889 = vst [vmem:[%s190_s29 + $0x10] sm:$0xff] %v1885_v58 }
 0x2a9   : > { %1890 = vst [vmem:[%s190_s29 + $0x18] sm:$0xff] %v1886_v59 }
 0x2aa   : > { %2340 = shalt.err (!%p2337_p3)
}
 0x2ab   : > { %s2341_s12 = scalar_lea.hbm %s2942_s7, 512  ;;  %s2345_s22 = scalar_lea.hbm %s2992_s4, 1024 }
 0x2ac   : > { %p2342_p4 = scmp.ne.s32.totalorder %s2942_s7, %s2341_s12  ;;  %p2346_p9 = scmp.lt.u32.totalorder %s2942_s7, %s2992_s4 }
 0x2ad   : > { %p2347_p10 = scmp.lt.u32.totalorder %s2345_s22, %s2341_s12  ;;  %p2349_p12 = scmp.lt.u32.totalorder %s2341_s12, %s2942_s7 }
 0x2ae   : > { %p2343_p7 = pnand %p2342_p4, %p2471_p5 }
 0x2af   : > { %p2348_p11 = por %p2347_p10, %p2346_p9 }
 0x2b0   : > { %p2344_p8 = pneg %p2343_p7 }
 0x2b1   : > { %p2350_p13 = por %p2349_p12, %p2348_p11 }
 0x2b3   : > { %p2351_p0 = pnand %p2350_p13, %p2344_p8 }
 0x2b5   : > { %2354 = shalt.err (!%p2351_p0)
}
 0x2b6   : > { %s2407_s28 = smov 256  }
 0x2b7   : > { %2222 = dma.vmem_to_hbm [thread:$0]  (%p2471_p5), %s2944_s30, 512, %s2942_s7, %s2946_s19, %s2407_s28, %s2407_s28, %s2398_s14  }
 0x2b8 PF: > { %p2228_p1 = scmp.ge.s32.totalorder %s2389_s18, 2  ;;  %s1920_s29 = sand.u32 1, %s2377_s15  }
 0x2b9   : > { %s1921_s5 = scalar_lea.sflag [#allocation3], %s1920_s29 }
 0x2ba   : > { %p2225_p2 = pnand %p2228_p1, %p2475_p6 }
 0x2bc   : > { %2372 = dma.done.wait (!%p2225_p2), %s1921_s5, 512  }
 0x2bd   : > { %2374 = vsyncadd (!%p2225_p2), %s1921_s5, 4294966784  ;;  %p14_p3 = scmp.ge.s32.totalorder %s2458_s21, 4   ;;  %s2995_s15 = smov %s2381_s16 }
 0x2be   : > { %s2996_s16 = smov %s2385_s17  ;;  %s2997_s17 = smov %s2469_s24 }
 0x2bf   : > { %s2998_s18 = smov %s2458_s21  ;;  %16 = sbr.rel (!%p14_p3) target bundleno = 3 (0x3), region = 79 }
 0x2c6   :  { %1926 = vsyncpa [#allocation3], 1 }
 0x2c7   :  { %1928 = vsyncpa [#allocation3 + $0x1], 1 }

</bundles_post_ra>
